<compile_context>
chip_gen: v6e
topology: v6e:2x2x1
jax: 0.10.0
libtpu: 0.0.40
codegen_flags: <defaults>
</compile_context>

<pallas_src>
import functools

import jax
import jax.numpy as jnp
from jax.experimental import pallas as pl
from jax.experimental.pallas import tpu as pltpu


def _loss_kernel(yhat_ref, y_ref, out_ref, acc_ref, *, temp, num_classes,
                 batch, tile_b):
    i = pl.program_id(0)

    @pl.when(i == 0)
    def _():
        acc_ref[...] = jnp.zeros_like(acc_ref)

    x = yhat_ref[...].astype(jnp.float32)            # (TB, C) f32 working copy
    labels = y_ref[...]                              # (TB, 1) int32
    tb, c = x.shape

    # Numerically stable log-sum-exp per row (exp lives on the EUP slot).
    m = jnp.max(x, axis=-1, keepdims=True)
    shifted = x - m                                  # <= 0 everywhere
    lse = jnp.log(jnp.sum(jnp.exp(shifted), axis=-1, keepdims=True))  # (TB,1)

    # Masks: label one-hot and same-parity-excluding-label.
    cls = jax.lax.broadcasted_iota(jnp.int32, (tb, c), 1)
    is_label = cls == labels
    parity_mask = jnp.logical_and((cls & 1) == (labels & 1),
                                  jnp.logical_not(is_label))

    # Fused smoothing — never build logp or y_smooth.
    shifted_label = jnp.sum(jnp.where(is_label, shifted, 0.0),
                            axis=-1, keepdims=True)                    # (TB,1)
    s_par = jnp.sum(jnp.where(parity_mask, shifted, 0.0),
                    axis=-1, keepdims=True)                            # (TB,1)
    n_par = jnp.sum(parity_mask.astype(jnp.float32),
                    axis=-1, keepdims=True)                            # (TB,1)

    smooth_val = jnp.float32(temp / (num_classes // 2 - 1))
    per_row = (jnp.float32(1.0 - temp) * (lse - shifted_label)
               + smooth_val * (n_par * lse - s_par))                   # (TB,1)

    # Mask rows past the true batch size (last tile may be padded with garbage,
    # possibly NaN — use a select, not a multiply, so NaN cannot leak through).
    row_ids = i * tile_b + jax.lax.broadcasted_iota(jnp.int32, (tb, 1), 0)
    contrib = jnp.where(row_ids < batch, per_row, 0.0)

    acc_ref[...] += jnp.sum(contrib, keepdims=True)                    # (1,1)

    @pl.when(i == pl.num_programs(0) - 1)
    def _():
        out_ref[...] = (acc_ref[...] / jnp.float32(batch)).astype(out_ref.dtype)


def _pick_row_tile(batch, num_classes):
    """Largest row tile targeting ~8 MiB of f32 working set (lanes pad to 128)."""
    c_eff = ((num_classes + 127) // 128) * 128
    tb = (8 * 1024 * 1024) // (4 * c_eff)
    tb = max(8, (tb // 8) * 8)
    if batch <= tb:
        return batch        # full-extent row block is always a legal block
    return tb               # multiple of 8, strictly less than batch


def score_label_smoothed_ce_loss(y_hat, y, *, temp, num_classes, tile_b=None):
    """y_hat: (B, C) float (any float dtype, DMA'd natively); y: (B,) int labels.

    Returns a scalar f32 loss matching ScoreLabelSmoothedCrossEntropyLoss.
    """
    B, C = y_hat.shape
    assert C == num_classes
    assert num_classes >= 4, "smoothing divides by (num_classes // 2 - 1)"

    y2d = y.astype(jnp.int32).reshape(B, 1)
    if tile_b is None:
        tile_b = _pick_row_tile(B, C)
    grid = (pl.cdiv(B, tile_b),)

    kernel = functools.partial(_loss_kernel, temp=float(temp),
                               num_classes=int(num_classes),
                               batch=int(B), tile_b=int(tile_b))
    out = pl.pallas_call(
        kernel,
        out_shape=jax.ShapeDtypeStruct((1, 1), jnp.float32),
        grid=grid,
        in_specs=[
            pl.BlockSpec((tile_b, C), lambda i: (i, 0)),
            pl.BlockSpec((tile_b, 1), lambda i: (i, 0)),
        ],
        out_specs=pl.BlockSpec((1, 1), lambda i: (0, 0)),
        scratch_shapes=[pltpu.VMEM((1, 1), jnp.float32)],
        compiler_params=pltpu.CompilerParams(
            dimension_semantics=("arbitrary",),      # axis carries accumulator
            vmem_limit_bytes=48 * 1024 * 1024,       # > defaults, < v7x 64 MiB
        ),
    )(y_hat, y2d)     # NOTE: no host-side f32 cast — native dtype is DMA'd
    return out[0, 0]


def _reference(y_hat, y, temp, num_classes):
    # Pure-JAX reference mirroring the PyTorch module.
    logp = jax.nn.log_softmax(y_hat.astype(jnp.float32), axis=-1)
    B, C = y_hat.shape
    one_hot = jax.nn.one_hot(y, C, dtype=jnp.float32)
    cls = jnp.arange(C)[None, :]
    lbl = y[:, None]
    same_parity = (cls % 2) == (lbl % 2)
    not_label = cls != lbl
    y_smooth = jnp.where(same_parity & not_label,
                         temp / (num_classes // 2 - 1), 0.0)
    y_smooth = y_smooth + (1.0 - temp) * one_hot
    return jnp.mean(jnp.sum(-y_smooth * logp, axis=-1))


if __name__ == "__main__":
    temp = 0.1
    num_classes = 10

    key = jax.random.PRNGKey(0)
    k1, k2, k3, k4 = jax.random.split(key, 4)

    # Test 1: f32 logits, single tile.
    B = 8
    y_hat = jax.random.normal(k1, (B, num_classes), dtype=jnp.float32)
    y = jax.random.randint(k2, (B,), 0, num_classes, dtype=jnp.int32)
    loss = score_label_smoothed_ce_loss(y_hat, y, temp=temp,
                                        num_classes=num_classes)
    jax.block_until_ready(loss)
    ref = _reference(y_hat, y, temp, num_classes)
    assert jnp.allclose(loss, ref, rtol=1e-5, atol=1e-5), (loss, ref)

    # Test 2: bf16 logits fed natively, multi-tile grid with padded last tile.
    B2 = 20
    y_hat2 = jax.random.normal(k3, (B2, num_classes), dtype=jnp.bfloat16)
    y2 = jax.random.randint(k4, (B2,), 0, num_classes, dtype=jnp.int32)
    loss2 = score_label_smoothed_ce_loss(y_hat2, y2, temp=temp,
                                         num_classes=num_classes, tile_b=8)
    jax.block_until_ready(loss2)
    ref2 = _reference(y_hat2.astype(jnp.float32), y2, temp, num_classes)
    assert jnp.allclose(loss2, ref2, rtol=1e-4, atol=1e-5), (loss2, ref2)

    print("KERNEL_OK")
</pallas_src>

<mosaic_0001>
module attributes {stable_mosaic.version = 11 : i64} {
  func.func @_loss_kernel(%arg0: i32, %arg1: memref<8x10xf32, #tpu.memory_space<vmem>>, %arg2: memref<8x1xi32, #tpu.memory_space<vmem>>, %arg3: memref<1x1xf32, #tpu.memory_space<vmem>>, %arg4: memref<1x1xf32, #tpu.memory_space<vmem>>) attributes {dimension_semantics = [#tpu.dimension_semantics<arbitrary>], iteration_bounds = array<i64: 1>, scalar_prefetch = 0 : i64, scratch_operands = 1 : i64, tpu.core_type = #tpu.core_type<tc>, window_params = [{transform_indices = @transform_0, window_bounds = array<i64: 8, 10>}, {transform_indices = @transform_1, window_bounds = array<i64: 8, 1>}, {pipeline_mode = #tpu.pipeline_mode<synchronous>, transform_indices = @transform_2, window_bounds = array<i64: 1, 1>}]} {
    %c0_i32 = arith.constant 0 : i32
    %0 = arith.cmpi eq, %arg0, %c0_i32 : i32
    %1 = arith.extui %0 : i1 to i32
    %c0_i32_0 = arith.constant 0 : i32
    %2 = arith.cmpi ne, %1, %c0_i32_0 : i32
    scf.if %2 {
      %cst_23 = arith.constant 0.000000e+00 : f32
      %63 = vector.broadcast %cst_23 : f32 to vector<1x1xf32>
      %c0_24 = arith.constant 0 : index
      %c0_25 = arith.constant 0 : index
      %64 = vector.load %arg4[%c0_24, %c0_25] : memref<1x1xf32, #tpu.memory_space<vmem>>, vector<1x1xf32>
      tpu.vector_store %arg4[%c0_24, %c0_25], %63 {strides = array<i32>} : memref<1x1xf32, #tpu.memory_space<vmem>>, vector<1x1xf32>,
    } else {
    }
    %c0 = arith.constant 0 : index
    %c0_1 = arith.constant 0 : index
    %3 = vector.load %arg1[%c0, %c0_1] : memref<8x10xf32, #tpu.memory_space<vmem>>, vector<8x10xf32>
    %c0_2 = arith.constant 0 : index
    %c0_3 = arith.constant 0 : index
    %4 = vector.load %arg2[%c0_2, %c0_3] : memref<8x1xi32, #tpu.memory_space<vmem>>, vector<8x1xi32>
    %cst = arith.constant dense<0xFF800000> : vector<8xf32>
    %5 = vector.multi_reduction <maximumf>, %3, %cst [1] : vector<8x10xf32> to vector<8xf32>
    %6 = vector.shape_cast %5 : vector<8xf32> to vector<8x1xf32>
    %7 = vector.broadcast %6 : vector<8x1xf32> to vector<8x10xf32>
    %8 = arith.subf %3, %7 : vector<8x10xf32>
    %9 = math.exp %8 : vector<8x10xf32>
    %cst_4 = arith.constant dense<0.000000e+00> : vector<8xf32>
    %10 = vector.multi_reduction <add>, %9, %cst_4 [1] : vector<8x10xf32> to vector<8xf32>
    %11 = vector.shape_cast %10 : vector<8xf32> to vector<8x1xf32>
    %12 = math.log %11 : vector<8x1xf32>
    %13 = tpu.iota {dimensions = array<i32: 1>} : vector<8x10xi32>
    %14 = vector.broadcast %4 : vector<8x1xi32> to vector<8x10xi32>
    %15 = arith.cmpi eq, %13, %14 : vector<8x10xi32>
    %c1_i32 = arith.constant 1 : i32
    %16 = vector.broadcast %c1_i32 : i32 to vector<8x10xi32>
    %17 = arith.andi %13, %16 : vector<8x10xi32>
    %c1_i32_5 = arith.constant 1 : i32
    %18 = vector.broadcast %c1_i32_5 : i32 to vector<8x1xi32>
    %19 = arith.andi %4, %18 : vector<8x1xi32>
    %20 = vector.broadcast %19 : vector<8x1xi32> to vector<8x10xi32>
    %21 = arith.cmpi eq, %17, %20 : vector<8x10xi32>
    %cst_6 = arith.constant dense<true> : vector<8x10xi1>
    %22 = arith.xori %15, %cst_6 : vector<8x10xi1>
    %23 = arith.andi %21, %22 : vector<8x10xi1>
    %cst_7 = arith.constant 0.000000e+00 : f32
    %24 = vector.broadcast %cst_7 : f32 to vector<8x10xf32>
    %25 = arith.select %15, %8, %24 : vector<8x10xi1>, vector<8x10xf32>
    %cst_8 = arith.constant dense<0.000000e+00> : vector<8xf32>
    %26 = vector.multi_reduction <add>, %25, %cst_8 [1] : vector<8x10xf32> to vector<8xf32>
    %27 = vector.shape_cast %26 : vector<8xf32> to vector<8x1xf32>
    %cst_9 = arith.constant 0.000000e+00 : f32
    %28 = vector.broadcast %cst_9 : f32 to vector<8x10xf32>
    %29 = arith.select %23, %8, %28 : vector<8x10xi1>, vector<8x10xf32>
    %cst_10 = arith.constant dense<0.000000e+00> : vector<8xf32>
    %30 = vector.multi_reduction <add>, %29, %cst_10 [1] : vector<8x10xf32> to vector<8xf32>
    %31 = vector.shape_cast %30 : vector<8xf32> to vector<8x1xf32>
    %32 = arith.extui %23 : vector<8x10xi1> to vector<8x10xi32>
    %33 = arith.sitofp %32 : vector<8x10xi32> to vector<8x10xf32>
    %cst_11 = arith.constant dense<0.000000e+00> : vector<8xf32>
    %34 = vector.multi_reduction <add>, %33, %cst_11 [1] : vector<8x10xf32> to vector<8xf32>
    %35 = vector.shape_cast %34 : vector<8xf32> to vector<8x1xf32>
    %36 = arith.subf %12, %27 : vector<8x1xf32>
    %cst_12 = arith.constant 0.899999976 : f32
    %37 = vector.broadcast %cst_12 : f32 to vector<8x1xf32>
    %38 = arith.mulf %37, %36 : vector<8x1xf32>
    %39 = arith.mulf %35, %12 : vector<8x1xf32>
    %40 = arith.subf %39, %31 : vector<8x1xf32>
    %cst_13 = arith.constant 2.500000e-02 : f32
    %41 = vector.broadcast %cst_13 : f32 to vector<8x1xf32>
    %42 = arith.mulf %41, %40 : vector<8x1xf32>
    %43 = arith.addf %38, %42 : vector<8x1xf32>
    %c8_i32 = arith.constant 8 : i32
    %44 = arith.muli %arg0, %c8_i32 : i32
    %45 = tpu.iota {dimensions = array<i32: 0>} : vector<8x1xi32>
    %46 = vector.broadcast %44 : i32 to vector<8x1xi32>
    %47 = arith.addi %46, %45 : vector<8x1xi32>
    %c8_i32_14 = arith.constant 8 : i32
    %48 = vector.broadcast %c8_i32_14 : i32 to vector<8x1xi32>
    %49 = arith.cmpi slt, %47, %48 : vector<8x1xi32>
    %cst_15 = arith.constant 0.000000e+00 : f32
    %50 = vector.broadcast %cst_15 : f32 to vector<8x1xf32>
    %51 = arith.select %49, %43, %50 : vector<8x1xi1>, vector<8x1xf32>
    %c0_16 = arith.constant 0 : index
    %c0_17 = arith.constant 0 : index
    %52 = vector.load %arg4[%c0_16, %c0_17] : memref<1x1xf32, #tpu.memory_space<vmem>>, vector<1x1xf32>
    %53 = vector.shape_cast %51 : vector<8x1xf32> to vector<1x8x1xf32>
    %cst_18 = arith.constant dense<0.000000e+00> : vector<1xf32>
    %54 = vector.multi_reduction <add>, %53, %cst_18 [1, 2] : vector<1x8x1xf32> to vector<1xf32>
    %55 = vector.shape_cast %54 : vector<1xf32> to vector<1x1x1xf32>
    %56 = vector.extract %55[0, 0, 0] : f32 from vector<1x1x1xf32>
    %57 = vector.broadcast %56 : f32 to vector<1x1xf32>
    %58 = arith.addf %52, %57 : vector<1x1xf32>
    %c0_19 = arith.constant 0 : index
    %c0_20 = arith.constant 0 : index
    %59 = vector.load %arg4[%c0_19, %c0_20] : memref<1x1xf32, #tpu.memory_space<vmem>>, vector<1x1xf32>
    tpu.vector_store %arg4[%c0_19, %c0_20], %58 {strides = array<i32>} : memref<1x1xf32, #tpu.memory_space<vmem>>, vector<1x1xf32>,
    %c0_i32_21 = arith.constant 0 : i32
    %60 = arith.cmpi eq, %arg0, %c0_i32_21 : i32
    %61 = arith.extui %60 : i1 to i32
    %c0_i32_22 = arith.constant 0 : i32
    %62 = arith.cmpi ne, %61, %c0_i32_22 : i32
    scf.if %62 {
      %c0_23 = arith.constant 0 : index
      %c0_24 = arith.constant 0 : index
      %63 = vector.load %arg4[%c0_23, %c0_24] : memref<1x1xf32, #tpu.memory_space<vmem>>, vector<1x1xf32>
      %cst_25 = arith.constant 8.000000e+00 : f32
      %64 = vector.broadcast %cst_25 : f32 to vector<1x1xf32>
      %65 = arith.divf %63, %64 : vector<1x1xf32>
      %c0_26 = arith.constant 0 : index
      %c0_27 = arith.constant 0 : index
      %66 = vector.load %arg3[%c0_26, %c0_27] : memref<1x1xf32, #tpu.memory_space<vmem>>, vector<1x1xf32>
      tpu.vector_store %arg3[%c0_26, %c0_27], %65 {strides = array<i32>} : memref<1x1xf32, #tpu.memory_space<vmem>>, vector<1x1xf32>,
    } else {
    }
    return
  }
  func.func @transform_0(%arg0: i32) -> (i32, i32) {
    %c0_i32 = arith.constant 0 : i32
    %c0_i32_0 = arith.constant 0 : i32
    return %arg0, %c0_i32 : i32, i32
  }
  func.func @transform_1(%arg0: i32) -> (i32, i32) {
    %c0_i32 = arith.constant 0 : i32
    %c0_i32_0 = arith.constant 0 : i32
    return %arg0, %c0_i32 : i32, i32
  }
  func.func @transform_2(%arg0: i32) -> (i32, i32) {
    %c0_i32 = arith.constant 0 : i32
    %c0_i32_0 = arith.constant 0 : i32
    %c0_i32_1 = arith.constant 0 : i32
    return %c0_i32, %c0_i32_0 : i32, i32
  }
}

</mosaic_0001>

<bundles_post_ra>
// kernel: tpu_custom_call.1
= control target key start
LH: loop header
LB: loop body
LE: loop exit
PB: predicated region body
PF: predicated region fallthrough
CT: control target
= control target key end

     0   :  { %vm20_vm0 = vcmask 80896   ;;  %s180_s0 = inlined_call_operand.vmem [shape: f32[8,10], index: 0, kind: input, shape index: {}]   ;;  %s181_s1 = inlined_call_operand.vmem [shape: s32[8,1], index: 1, kind: input, shape index: {}]   ;;  %s182_s2 = inlined_call_operand.hbm [shape: f32[1,1], index: 2, kind: output, shape index: {}]  }
   0x1   :  { %v18_v0 = vld [vmem:[%s180_s0] sm:$0xff] }
   0x2   :  { %v19_v1 = vld [vmem:[%s181_s1] sm:$0xff] }
   0x3   :  { %7 = vsyncpa [#allocation4], 0  ;;  %v21_v2 = vsel %vm20_vm0, %v18_v0, -inf  ;;  %v144_v3 = vmov 0   ;;  %v39_v4 = vand.u32 1, %v19_v1  ;;  %vm16_vm1 = vcmask 0  }
   0x4   :  { %116 = vset.pattern.permute.xlu0 %v144_v3  ;;  %117 = vset.pattern.permute.xlu1 %v144_v3  ;;  %v145_v5 = vmov 0.0   ;;  %v32_v6 = vlaneseq  ;;  %vm146_vm4 = vmmov 1   ;;  %vm73_vm7 = vcmask 7168   ;;  %s147_s1 = smov [#allocation3]  }
   0x5   :  { %22 = vmax.xlane.f32.xlu0 %v21_v2  ;;  %41 = vperm.xlu1 %117, %v39_v4   ;;  %17 = vst.msk [vmem:[#allocation2] sm:$0x1] %vm16_vm1, %v145_v5  ;;  %s101_s13 = sshll.u32 %s147_s1, 4  ;;  %s102_s13 = int_to_ptr.vmem [resolvable:$true] %s101_s13 }
   0x6   :  { %v33_v8 = vand.u32 127, %v32_v6  ;;  %s122_s14 = scalar_lea.vmem %s102_s13, 16  ;;  %s126_s15 = scalar_lea.vmem %s102_s13, 32 }
   0x7   :  { %p123_p0 = scmp.ne.s32.totalorder %s102_s13, %s122_s14  ;;  %p127_p1 = scmp.lt.s32.totalorder %s102_s13, %s102_s13 }
   0x8   :  { %v38_v11 = vand.u32 1, %v33_v8  ;;  %p128_p2 = scmp.lt.s32.totalorder %s126_s15, %s122_s14 }
   0xa   :  { %p129_p3 = por %p128_p2, %p127_p1 }
   0xc   :  { %v72_v42 = vld [vmem:[#allocation2] sm:$0x1]  ;;  %p130_p4 = pnand %p129_p3, %p123_p0 }
  0x1b   :  { %35 = vperm.xlu0 %116, %v19_v1  }
  0x80   :  { %v42_v12 = vpop.permute.xlu1 %41 }
  0x81   :  { %vm43_vm2 = vcmp.eq.s32.totalorder %v38_v11, %v42_v12 }
  0x8e   :  { %v23_v7 = vpop.xlane.xlu0 %22 }
  0x8f   :  { %v24_v9 = vsub.f32 %v18_v0, %v23_v7 }
  0x91   :  { %v25_v10 = vmul.f32 1.442695, %v24_v9 }
  0x93   :  { %118 = vpow2.f32 %v25_v10 }
  0x96   :  { %v36_v13 = vpop.permute.xlu0 %35 }
  0x97   :  { %vm37_vm3 = vcmp.eq.s32.totalorder %v33_v8, %v36_v13 }
  0x98   :  { %vm44_vm5 = vmxor %vm37_vm3, %vm146_vm4  ;;  %v46_v20 = vsel %vm37_vm3, %v24_v9, 0.0 }
  0x99   :  { %vm45_vm6 = vmand %vm43_vm2, %vm44_vm5  ;;  %v47_v21 = vsel %vm20_vm0, %v46_v20, 0.0 }
  0x9a   :  { %v50_v14 = vsel %vm45_vm6, %v24_v9, 0.0  ;;  %v109_v17 = vsel %vm45_vm6, 1.0, %v145_v5 }
  0x9b   :  { %v51_v15 = vsel %vm20_vm0, %v50_v14, 0.0  ;;  %v56_v19 = vsel %vm20_vm0, %v109_v17, 0.0 }
  0x9c   :  { %52 = vadd.xlane.f32.xlu0 %v51_v15 }
  0xa0   :  { %v119_v16 = vpop.eup %118 }
  0xa1   :  { %v27_v18 = vsel %vm20_vm0, %v119_v16, 0.0 }
  0xa2   :  { %28 = vadd.xlane.f32.xlu1 %v27_v18 }
  0xa6   :  { %57 = vadd.xlane.f32.xlu1 %v56_v19 }
  0xaa   :  { %48 = vadd.xlane.f32.xlu1 %v47_v21 }
 0x125   :  { %v53_v29 = vpop.xlane.xlu0 %52 }
 0x12b   :  { %v29_v22 = vpop.xlane.xlu1 %28 }
 0x12c   :  { %120 = vlog2.f32 %v29_v22 }
 0x12f   :  { %v58_v23 = vpop.xlane.xlu1 %57 }
 0x133   :  { %v49_v26 = vpop.xlane.xlu1 %48 }
 0x139   :  { %v121_v24 = vpop.eup %120 }
 0x13a   :  { %v31_v25 = vmul.f32 0.6931472, %v121_v24 }
 0x13c   :  { %v61_v27 = vmul.f32 %v58_v23, %v31_v25  ;;  %v59_v28 = vsub.f32 %v31_v25, %v49_v26 }
 0x13e   :  { %v62_v30 = vsub.f32 %v61_v27, %v53_v29  ;;  %v60_v32 = vmul.f32 0.9, %v59_v28 }
 0x140   :  { %v63_v31 = vmul.f32 0.025, %v62_v30 }
 0x142   :  { %v64_v33 = vadd.f32 %v63_v31, %v60_v32 }
 0x144   :  { %v74_v34 = vsel %vm73_vm7, %v64_v33, 0.0 }
 0x145   :  { %75 = vadd.xlane.f32.xlu1 %v74_v34 }
 0x1ce   :  { %v76_v35 = vpop.xlane.xlu1 %75 }
 0x1cf   :  { %v77_v36 = vrot.slane %v76_v35, 4 }
 0x1d1   :  { %v78_v37 = vadd.f32 %v77_v36, %v76_v35 }
 0x1d3   :  { %v79_v38 = vrot.slane %v78_v37, 2 }
 0x1d5   :  { %v80_v39 = vadd.f32 %v79_v38, %v78_v37 }
 0x1d7   :  { %v81_v40 = vrot.slane %v80_v39, 1 }
 0x1d9   :  { %v82_v41 = vadd.f32 %v81_v40, %v80_v39 }
 0x1db   :  { %110 = vpush %v82_v41 }
 0x20c   :  { %s111_s0 = spop %110 }
 0x20d   :  { %v84_v43 = vstv %s111_s0 }
 0x20e   :  { %v85_v44 = vadd.f32 %v84_v43, %v72_v42 }
 0x210   :  { %87 = vst.msk [vmem:[#allocation2] sm:$0x1] %vm16_vm1, %v85_v44 }
 0x217   :  { %v91_v45 = vld [vmem:[#allocation2] sm:$0x1] }
 0x218   :  { %v93_v46 = vmul.f32 0.125, %v91_v45 }
 0x21a   :  { %94 = vst.msk [vmem:[#allocation3] sm:$0x1] %vm16_vm1, %v93_v46 }
 0x21b   :  { %133 = shalt.err (!%p130_p4)
}
 0x21c   :  { %104 = dma.vmem_to_hbm [thread:$0]  %s102_s13, 16, %s182_s2, [#allocation4]  }
 0x21d   :  { %142 = dma.done.wait [#allocation4], 16  }
 0x21e   :  { %143 = vsyncadd [#allocation4], 4294967280 }
 0x21f   :  { %108 = vsyncpa [#allocation4], 1 }

</bundles_post_ra>
